<compile_context>
chip_gen: v5e
topology: v5e:2x2
jax: 0.10.0
libtpu: 0.0.40
codegen_flags: <defaults>
</compile_context>

<pallas_src>
import functools
import math

import jax
import jax.numpy as jnp
from jax import lax
from jax.experimental import pallas as pl
from jax.experimental.pallas import tpu as pltpu


def _mha_kernel(x_ref, c_ref, bias_ref,
                wq_ref, bq_ref, wkv_ref, bkv_ref, wo_ref, bo_ref,
                o_ref, k_scr, v_scr, *, n_heads):
    # x_ref:    (1, C, TQ)    bf16   query-side tile, channel-major
    # c_ref:    (1, C, Ts)    bf16   key/value side, channel-major (invariant in t)
    # bias_ref: (1, TQ, Ts)   f32    additive mask bias (0 or -1e4)
    # wq_ref:   (C, C)        bf16   conv_q weight, pre-scaled by k_channels**-0.5
    # wkv_ref:  (2C, C)       bf16   [conv_k; conv_v] stacked
    # wo_ref:   (Cout, C)     bf16   conv_o weight (used as-is; output stays NCT)
    # bq/bkv/bo: (C,1)/(2C,1)/(Cout,1) f32
    # o_ref:    (1, Cout, TQ) f32    output tile in NCT layout
    # k_scr/v_scr: (C, Ts)    bf16   per-batch cached K/V (VMEM scratch)
    C = wq_ref.shape[0]
    kc = C // n_heads
    Ts = k_scr.shape[1]

    # ---- K/V projection: once per batch (query-tile axis runs sequentially) ----
    @pl.when(pl.program_id(1) == 0)
    def _():
        cmat = c_ref[0]                                               # (C, Ts) bf16
        kv = jnp.dot(wkv_ref[...], cmat,
                     preferred_element_type=jnp.float32) + bkv_ref[...]  # (2C, Ts) f32
        k_scr[...] = kv[:C, :].astype(k_scr.dtype)
        v_scr[...] = kv[C:, :].astype(v_scr.dtype)

    # ---- Q projection for this query tile (attention scale pre-folded) ---------
    x = x_ref[0]                                                      # (C, TQ) bf16
    q = jnp.dot(wq_ref[...], x,
                preferred_element_type=jnp.float32) + bq_ref[...]     # (C, TQ) f32
    q = q.astype(jnp.bfloat16)
    TQ = q.shape[1]

    # Head split is a free leading-dim reshape (C = H * kc, head-major).
    q3 = q.reshape(n_heads, kc, TQ)
    k3 = k_scr[...].reshape(n_heads, kc, Ts)
    v3 = v_scr[...].reshape(n_heads, kc, Ts)

    # scores[h, t, s] = sum_d q3[h, d, t] * k3[h, d, s]
    scores = lax.dot_general(q3, k3, (((1,), (1,)), ((0,), (0,))),
                             preferred_element_type=jnp.float32)      # (H, TQ, Ts)
    scores = scores + bias_ref[0]          # additive mask bias, broadcast over heads

    # Exact softmax over the key axis (f32).  Note: out-of-range rows of a partial
    # last query tile operate on garbage but are discarded on write.
    m = jnp.max(scores, axis=-1, keepdims=True)
    p = jnp.exp(scores - m)
    p = p / jnp.sum(p, axis=-1, keepdims=True)

    # ctx[h, d, t] = sum_s v3[h, d, s] * p[h, t, s]   (channel-major per head)
    ctx = lax.dot_general(v3, p.astype(jnp.bfloat16),
                          (((2,), (2,)), ((0,), (0,))),
                          preferred_element_type=jnp.float32)         # (H, kc, TQ)
    ctx = ctx.reshape(C, TQ).astype(jnp.bfloat16)     # head concat: free dim merge

    # conv_o: one K=C matmul; the output stays channel-major (module's NCT layout).
    out = jnp.dot(wo_ref[...], ctx,
                  preferred_element_type=jnp.float32) + bo_ref[...]   # (Cout, TQ)
    o_ref[0] = out.astype(o_ref.dtype)


def _vmem_limit_bytes():
    # Generation-aware VMEM budget: ~3/4 of physical capacity, capped.
    # (128 MiB on v5e/v6e -> 96 MiB; 64 MiB on v7x -> 48 MiB; fallback 48 MiB.)
    cap = 64 * 1024 * 1024
    try:
        cap = int(pltpu.get_tpu_info().vmem_capacity_bytes)
    except Exception:
        pass
    return max(32 * 1024 * 1024, min(cap * 3 // 4, 96 * 1024 * 1024))


def multi_head_attention(x, c, attn_mask, params, *, n_heads,
                         q_tile=256, out_dtype=jnp.float32):
    """Forward pass of MultiHeadAttention (window_size=None, p_dropout=0).

    x: (B, C, Tt) query-side input, c: (B, C, Ts) key/value-side input,
    attn_mask: (B, 1, Tt, Ts) or (B, Tt, Ts) with 0 = masked, or None.
    Returns (B, out_channels, Tt) in the module's NCT layout.
    """
    B, C, Tt = x.shape
    Ts = c.shape[-1]
    wq, bq, wk, bk, wv, bv, wo, bo = params
    Cout = wo.shape[0]
    assert C % n_heads == 0
    kc = C // n_heads
    scale = kc ** -0.5

    # ---- Host-side precision / layout plumbing (done once) ---------------------
    wq_s = (wq * scale).astype(jnp.bfloat16)                  # fold attn scale into q
    bq_s = (bq * scale).reshape(C, 1).astype(jnp.float32)
    wkv = jnp.concatenate([wk, wv], axis=0).astype(jnp.bfloat16)        # (2C, C)
    bkv = jnp.concatenate([bk, bv], axis=0).reshape(2 * C, 1).astype(jnp.float32)
    wo_b = wo.astype(jnp.bfloat16)                            # (Cout, C)
    bo_c = bo.reshape(Cout, 1).astype(jnp.float32)
    x_b = x.astype(jnp.bfloat16)
    c_b = c.astype(jnp.bfloat16)

    # masked_fill(mask == 0, -1e4) expressed as a single additive bias.
    if attn_mask is None:
        bias = jnp.zeros((B, Tt, Ts), jnp.float32)
    else:
        m = attn_mask[:, 0] if attn_mask.ndim == 4 else attn_mask  # head dim shared
        bias = jnp.where(m == 0, jnp.float32(-10000.0),
                         jnp.float32(0.0)).astype(jnp.float32)

    # Query-time tiling: TQ must be the full extent or a multiple of 128.
    if Tt <= q_tile:
        TQ = Tt
    else:
        TQ = max(128, (q_tile // 128) * 128)
    nqt = pl.cdiv(Tt, TQ)

    cost = pl.CostEstimate(
        flops=int(B * (2 * C * C * Tt          # q projection
                       + 4 * C * C * Ts        # fused k/v projection (once / batch)
                       + 4 * C * Tt * Ts       # scores + p@v (all heads)
                       + 2 * Cout * C * Tt)),  # conv_o
        transcendentals=int(B * n_heads * Tt * Ts),
        bytes_accessed=int(B * (2 * C * Tt + 2 * C * Ts + 4 * Tt * Ts + 4 * Cout * Tt)
                           + 2 * (3 * C * C + Cout * C) + 4 * (3 * C + Cout)),
    )

    kernel = functools.partial(_mha_kernel, n_heads=n_heads)
    wspec = lambda shape: pl.BlockSpec(shape, lambda b, t: (0,) * len(shape))

    out = pl.pallas_call(
        kernel,
        out_shape=jax.ShapeDtypeStruct((B, Cout, Tt), out_dtype),
        grid_spec=pltpu.PrefetchScalarGridSpec(
            num_scalar_prefetch=0,
            grid=(B, nqt),                     # batch outer, query tiles inner
            in_specs=[
                pl.BlockSpec((1, C, TQ), lambda b, t: (b, 0, t)),    # x (query side)
                # c's index map is invariant in t: fetched once per batch, and the
                # projected K/V are cached in VMEM scratch across query tiles.
                pl.BlockSpec((1, C, Ts), lambda b, t: (b, 0, 0)),    # c (key/value)
                pl.BlockSpec((1, TQ, Ts), lambda b, t: (b, t, 0)),   # additive bias
                wspec((C, C)), wspec((C, 1)),           # conv_q (pre-scaled)
                wspec((2 * C, C)), wspec((2 * C, 1)),   # [conv_k; conv_v] fused
                wspec((Cout, C)), wspec((Cout, 1)),     # conv_o
            ],
            out_specs=pl.BlockSpec((1, Cout, TQ), lambda b, t: (b, 0, t)),
            scratch_shapes=[
                pltpu.VMEM((C, Ts), jnp.bfloat16),      # cached K (channel-major)
                pltpu.VMEM((C, Ts), jnp.bfloat16),      # cached V (channel-major)
            ],
        ),
        compiler_params=pltpu.CompilerParams(
            # t axis must be 'arbitrary': per-batch K/V scratch is filled at t == 0.
            dimension_semantics=("parallel", "arbitrary"),
            vmem_limit_bytes=_vmem_limit_bytes(),
        ),
        cost_estimate=cost,
    )(x_b, c_b, bias, wq_s, bq_s, wkv, bkv, wo_b, bo_c)

    return out


# ------------------------------- references ------------------------------------

def _xavier_uniform(key, shape):
    fan_out, fan_in = shape
    bound = math.sqrt(6.0 / (fan_in + fan_out))
    return jax.random.uniform(key, shape, jnp.float32, -bound, bound)


def _conv_bias(key, fan_in, fan_out):
    bound = 1.0 / math.sqrt(fan_in)
    return jax.random.uniform(key, (fan_out,), jnp.float32, -bound, bound)


def _reference_f32(x, c, attn_mask, params, *, n_heads):
    """Pure f32 reference mirroring the PyTorch module (window_size=None, dropout=0)."""
    wq, bq, wk, bk, wv, bv, wo, bo = params
    B, C, Tt = x.shape
    Ts = c.shape[-1]
    kc = C // n_heads
    q = jnp.einsum("oi,bit->bot", wq, x) + bq[None, :, None]
    k = jnp.einsum("oi,bit->bot", wk, c) + bk[None, :, None]
    v = jnp.einsum("oi,bit->bot", wv, c) + bv[None, :, None]
    qh = q.reshape(B, n_heads, kc, Tt).transpose(0, 1, 3, 2)
    kh = k.reshape(B, n_heads, kc, Ts).transpose(0, 1, 3, 2)
    vh = v.reshape(B, n_heads, kc, Ts).transpose(0, 1, 3, 2)
    scores = jnp.einsum("bhtd,bhsd->bhts", qh * (kc ** -0.5), kh)
    scores = jnp.where(attn_mask == 0, -10000.0, scores)
    p = jax.nn.softmax(scores, axis=-1)
    out = jnp.einsum("bhts,bhsd->bhtd", p, vh)
    out = out.transpose(0, 1, 3, 2).reshape(B, C, Tt)
    return jnp.einsum("oc,bct->bot", wo, out) + bo[None, :, None]


def _reference_bf16(x, c, attn_mask, params, *, n_heads):
    """Reference mirroring the kernel's precision choices (bf16 operands, f32 accum)."""
    wq, bq, wk, bk, wv, bv, wo, bo = params
    B, C, Tt = x.shape
    Ts = c.shape[-1]
    kc = C // n_heads
    scale = kc ** -0.5
    bf, f32 = jnp.bfloat16, jnp.float32
    xb, cb = x.astype(bf), c.astype(bf)
    q = (jnp.einsum("oi,bit->bot", (wq * scale).astype(bf), xb,
                    preferred_element_type=f32) + (bq * scale)[None, :, None]).astype(bf)
    k = (jnp.einsum("oi,bit->bot", wk.astype(bf), cb,
                    preferred_element_type=f32) + bk[None, :, None]).astype(bf)
    v = (jnp.einsum("oi,bit->bot", wv.astype(bf), cb,
                    preferred_element_type=f32) + bv[None, :, None]).astype(bf)
    q3 = q.reshape(B, n_heads, kc, Tt)
    k3 = k.reshape(B, n_heads, kc, Ts)
    v3 = v.reshape(B, n_heads, kc, Ts)
    scores = jnp.einsum("bhdt,bhds->bhts", q3, k3, preferred_element_type=f32)
    bias = jnp.where(attn_mask == 0, jnp.float32(-10000.0), jnp.float32(0.0))
    scores = scores + bias
    p = jax.nn.softmax(scores, axis=-1)
    ctx = jnp.einsum("bhds,bhts->bhdt", v3, p.astype(bf), preferred_element_type=f32)
    ctx = ctx.reshape(B, C, Tt).astype(bf)
    out = jnp.einsum("oc,bct->bot", wo.astype(bf), ctx, preferred_element_type=f32)
    return out + bo[None, :, None]


if __name__ == "__main__":
    # Small shapes: batch=2, channels=64, heads=2 (k_channels=32), Tt=16, Ts=24,
    # out_channels=48 (different from channels to exercise conv_o properly).
    B, C, Cout, H, Tt, Ts = 2, 64, 48, 2, 16, 24

    key = jax.random.PRNGKey(0)
    ks = jax.random.split(key, 10)

    wq = _xavier_uniform(ks[0], (C, C))
    wk = _xavier_uniform(ks[1], (C, C))
    wv = _xavier_uniform(ks[2], (C, C))
    wo = _xavier_uniform(ks[3], (Cout, C))
    bq = _conv_bias(ks[4], C, C)
    bk = _conv_bias(ks[5], C, C)
    bv = _conv_bias(ks[6], C, C)
    bo = _conv_bias(ks[7], C, Cout)
    params = (wq, bq, wk, bk, wv, bv, wo, bo)

    x = jax.random.normal(ks[8], (B, C, Tt), jnp.float32)
    c = jax.random.normal(ks[9], (B, C, Ts), jnp.float32)

    # Mask: batch 0 = banded ("causal-ish", every row keeps >= 1 key), batch 1 = all
    # ones; exercises both the masked_fill path and the unmasked path.
    row = jnp.arange(Tt)[:, None]
    col = jnp.arange(Ts)[None, :]
    mask0 = (col <= row + (Ts - Tt)).astype(jnp.float32)
    mask1 = jnp.ones((Tt, Ts), jnp.float32)
    attn_mask = jnp.stack([mask0, mask1])[:, None]            # (B, 1, Tt, Ts)

    out = multi_head_attention(x, c, attn_mask, params, n_heads=H)
    out = jax.block_until_ready(out)
    assert out.shape == (B, Cout, Tt), out.shape
    assert bool(jnp.isfinite(out).all()), "non-finite values in kernel output"

    # Strong check: reference with matching bf16 operand rounding (isolates kernel
    # structure / masking / head-split / bias correctness from bf16 rounding).
    ref_b = _reference_bf16(x, c, attn_mask, params, n_heads=H)
    err_b = float(jnp.max(jnp.abs(out - ref_b)))
    assert err_b < 3e-2, f"mismatch vs precision-matched reference: max|err|={err_b}"

    # Loose semantic check against the pure-f32 PyTorch-equivalent reference
    # (bf16 operands introduce small, bounded rounding differences).
    ref_f = _reference_f32(x, c, attn_mask, params, n_heads=H)
    err_f = float(jnp.max(jnp.abs(out - ref_f)))
    assert err_f < 2.5e-1, f"mismatch vs f32 reference: max|err|={err_f}"

    print("KERNEL_OK")
</pallas_src>

<mosaic_0001>
module attributes {stable_mosaic.version = 11 : i64} {
  func.func @_mha_kernel(%arg0: i32, %arg1: i32, %arg2: memref<1x64x16xbf16, #tpu.memory_space<vmem>>, %arg3: memref<1x64x24xbf16, #tpu.memory_space<vmem>>, %arg4: memref<1x16x24xf32, #tpu.memory_space<vmem>>, %arg5: memref<64x64xbf16, #tpu.memory_space<vmem>>, %arg6: memref<64x1xf32, #tpu.memory_space<vmem>>, %arg7: memref<128x64xbf16, #tpu.memory_space<vmem>>, %arg8: memref<128x1xf32, #tpu.memory_space<vmem>>, %arg9: memref<48x64xbf16, #tpu.memory_space<vmem>>, %arg10: memref<48x1xf32, #tpu.memory_space<vmem>>, %arg11: memref<1x48x16xf32, #tpu.memory_space<vmem>>, %arg12: memref<64x24xbf16, #tpu.memory_space<vmem>>, %arg13: memref<64x24xbf16, #tpu.memory_space<vmem>>) attributes {dimension_semantics = [#tpu.dimension_semantics<parallel>, #tpu.dimension_semantics<arbitrary>], iteration_bounds = array<i64: 2, 1>, scalar_prefetch = 0 : i64, scratch_operands = 2 : i64, tpu.core_type = #tpu.core_type<tc>, window_params = [{transform_indices = @transform_0, window_bounds = array<i64: 1, 64, 16>}, {transform_indices = @transform_1, window_bounds = array<i64: 1, 64, 24>}, {transform_indices = @transform_2, window_bounds = array<i64: 1, 16, 24>}, {pipeline_mode = #tpu.pipeline_mode<synchronous>, transform_indices = @transform_3, window_bounds = array<i64: 64, 64>}, {pipeline_mode = #tpu.pipeline_mode<synchronous>, transform_indices = @transform_4, window_bounds = array<i64: 64, 1>}, {pipeline_mode = #tpu.pipeline_mode<synchronous>, transform_indices = @transform_5, window_bounds = array<i64: 128, 64>}, {pipeline_mode = #tpu.pipeline_mode<synchronous>, transform_indices = @transform_6, window_bounds = array<i64: 128, 1>}, {pipeline_mode = #tpu.pipeline_mode<synchronous>, transform_indices = @transform_7, window_bounds = array<i64: 48, 64>}, {pipeline_mode = #tpu.pipeline_mode<synchronous>, transform_indices = @transform_8, window_bounds = array<i64: 48, 1>}, {transform_indices = @transform_9, window_bounds = array<i64: 1, 48, 16>}]} {
    %c0_i32 = arith.constant 0 : i32
    %0 = arith.cmpi eq, %arg1, %c0_i32 : i32
    %1 = arith.extui %0 : i1 to i32
    %c0_i32_0 = arith.constant 0 : i32
    %2 = arith.cmpi ne, %1, %c0_i32_0 : i32
    scf.if %2 {
      %c0_26 = arith.constant 0 : index
      %c0_27 = arith.constant 0 : index
      %c0_28 = arith.constant 0 : index
      %43 = vector.load %arg3[%c0_26, %c0_27, %c0_28] : memref<1x64x24xbf16, #tpu.memory_space<vmem>>, vector<1x64x24xbf16>
      %44 = vector.shape_cast %43 : vector<1x64x24xbf16> to vector<64x24xbf16>
      %c0_29 = arith.constant 0 : index
      %c0_30 = arith.constant 0 : index
      %45 = vector.load %arg7[%c0_29, %c0_30] : memref<128x64xbf16, #tpu.memory_space<vmem>>, vector<128x64xbf16>
      %cst_31 = arith.constant dense<0.000000e+00> : vector<128x24xf32>
      %46 = tpu.matmul %45, %44, %cst_31 {dimension_numbers = #tpu.dot_dimension_numbers<[1], [0], [0], [1], [0, 0, 1, 1], [], []>} : vector<128x64xbf16>, vector<64x24xbf16>, vector<128x24xf32> -> vector<128x24xf32>
      %c0_32 = arith.constant 0 : index
      %c0_33 = arith.constant 0 : index
      %47 = vector.load %arg8[%c0_32, %c0_33] : memref<128x1xf32, #tpu.memory_space<vmem>>, vector<128x1xf32>
      %48 = vector.broadcast %47 : vector<128x1xf32> to vector<128x24xf32>
      %49 = arith.addf %46, %48 : vector<128x24xf32>
      %50 = vector.extract_strided_slice %49 {offsets = [0, 0], sizes = [64, 24], strides = [1, 1]} : vector<128x24xf32> to vector<64x24xf32>
      %51 = arith.truncf %50 : vector<64x24xf32> to vector<64x24xbf16>
      %c0_34 = arith.constant 0 : index
      %c0_35 = arith.constant 0 : index
      %52 = vector.load %arg12[%c0_34, %c0_35] : memref<64x24xbf16, #tpu.memory_space<vmem>>, vector<64x24xbf16>
      tpu.vector_store %arg12[%c0_34, %c0_35], %51 {strides = array<i32>} : memref<64x24xbf16, #tpu.memory_space<vmem>>, vector<64x24xbf16>,
      %53 = vector.extract_strided_slice %49 {offsets = [64, 0], sizes = [64, 24], strides = [1, 1]} : vector<128x24xf32> to vector<64x24xf32>
      %54 = arith.truncf %53 : vector<64x24xf32> to vector<64x24xbf16>
      %c0_36 = arith.constant 0 : index
      %c0_37 = arith.constant 0 : index
      %55 = vector.load %arg13[%c0_36, %c0_37] : memref<64x24xbf16, #tpu.memory_space<vmem>>, vector<64x24xbf16>
      tpu.vector_store %arg13[%c0_36, %c0_37], %54 {strides = array<i32>} : memref<64x24xbf16, #tpu.memory_space<vmem>>, vector<64x24xbf16>,
    } else {
    }
    %c0 = arith.constant 0 : index
    %c0_1 = arith.constant 0 : index
    %c0_2 = arith.constant 0 : index
    %3 = vector.load %arg2[%c0, %c0_1, %c0_2] : memref<1x64x16xbf16, #tpu.memory_space<vmem>>, vector<1x64x16xbf16>
    %4 = vector.shape_cast %3 : vector<1x64x16xbf16> to vector<64x16xbf16>
    %c0_3 = arith.constant 0 : index
    %c0_4 = arith.constant 0 : index
    %5 = vector.load %arg5[%c0_3, %c0_4] : memref<64x64xbf16, #tpu.memory_space<vmem>>, vector<64x64xbf16>
    %cst = arith.constant dense<0.000000e+00> : vector<64x16xf32>
    %6 = tpu.matmul %5, %4, %cst {dimension_numbers = #tpu.dot_dimension_numbers<[1], [0], [0], [1], [0, 0, 1, 1], [], []>} : vector<64x64xbf16>, vector<64x16xbf16>, vector<64x16xf32> -> vector<64x16xf32>
    %c0_5 = arith.constant 0 : index
    %c0_6 = arith.constant 0 : index
    %7 = vector.load %arg6[%c0_5, %c0_6] : memref<64x1xf32, #tpu.memory_space<vmem>>, vector<64x1xf32>
    %8 = vector.broadcast %7 : vector<64x1xf32> to vector<64x16xf32>
    %9 = arith.addf %6, %8 : vector<64x16xf32>
    %10 = arith.truncf %9 : vector<64x16xf32> to vector<64x16xbf16>
    %11 = vector.shape_cast %10 : vector<64x16xbf16> to vector<2x32x16xbf16>
    %c0_7 = arith.constant 0 : index
    %c0_8 = arith.constant 0 : index
    %12 = vector.load %arg12[%c0_7, %c0_8] : memref<64x24xbf16, #tpu.memory_space<vmem>>, vector<64x24xbf16>
    %13 = vector.shape_cast %12 : vector<64x24xbf16> to vector<2x32x24xbf16>
    %c0_9 = arith.constant 0 : index
    %c0_10 = arith.constant 0 : index
    %14 = vector.load %arg13[%c0_9, %c0_10] : memref<64x24xbf16, #tpu.memory_space<vmem>>, vector<64x24xbf16>
    %15 = vector.shape_cast %14 : vector<64x24xbf16> to vector<2x32x24xbf16>
    %cst_11 = arith.constant dense<0.000000e+00> : vector<2x16x24xf32>
    %16 = tpu.matmul %11, %13, %cst_11 {dimension_numbers = #tpu.dot_dimension_numbers<[1], [1], [2], [2], [0, 0, 0, 2, 1, 2], [0], [0]>} : vector<2x32x16xbf16>, vector<2x32x24xbf16>, vector<2x16x24xf32> -> vector<2x16x24xf32>
    %c0_12 = arith.constant 0 : index
    %c0_13 = arith.constant 0 : index
    %c0_14 = arith.constant 0 : index
    %17 = vector.load %arg4[%c0_12, %c0_13, %c0_14] : memref<1x16x24xf32, #tpu.memory_space<vmem>>, vector<1x16x24xf32>
    %18 = vector.shape_cast %17 : vector<1x16x24xf32> to vector<16x24xf32>
    %19 = vector.shape_cast %18 : vector<16x24xf32> to vector<1x16x24xf32>
    %20 = vector.broadcast %19 : vector<1x16x24xf32> to vector<2x16x24xf32>
    %21 = arith.addf %16, %20 : vector<2x16x24xf32>
    %cst_15 = arith.constant dense<0xFF800000> : vector<2x16xf32>
    %22 = vector.multi_reduction <maximumf>, %21, %cst_15 [2] : vector<2x16x24xf32> to vector<2x16xf32>
    %23 = vector.shape_cast %22 : vector<2x16xf32> to vector<2x16x1xf32>
    %24 = vector.broadcast %23 : vector<2x16x1xf32> to vector<2x16x24xf32>
    %25 = arith.subf %21, %24 : vector<2x16x24xf32>
    %26 = math.exp %25 : vector<2x16x24xf32>
    %cst_16 = arith.constant dense<0.000000e+00> : vector<2x16xf32>
    %27 = vector.multi_reduction <add>, %26, %cst_16 [2] : vector<2x16x24xf32> to vector<2x16xf32>
    %28 = vector.shape_cast %27 : vector<2x16xf32> to vector<2x16x1xf32>
    %29 = vector.broadcast %28 : vector<2x16x1xf32> to vector<2x16x24xf32>
    %30 = arith.divf %26, %29 : vector<2x16x24xf32>
    %31 = arith.truncf %30 : vector<2x16x24xf32> to vector<2x16x24xbf16>
    %cst_17 = arith.constant dense<0.000000e+00> : vector<2x32x16xf32>
    %32 = tpu.matmul %15, %31, %cst_17 {dimension_numbers = #tpu.dot_dimension_numbers<[2], [2], [1], [1], [0, 0, 0, 1, 1, 1], [0], [0]>} : vector<2x32x24xbf16>, vector<2x16x24xbf16>, vector<2x32x16xf32> -> vector<2x32x16xf32>
    %33 = vector.shape_cast %32 : vector<2x32x16xf32> to vector<64x16xf32>
    %34 = arith.truncf %33 : vector<64x16xf32> to vector<64x16xbf16>
    %c0_18 = arith.constant 0 : index
    %c0_19 = arith.constant 0 : index
    %35 = vector.load %arg9[%c0_18, %c0_19] : memref<48x64xbf16, #tpu.memory_space<vmem>>, vector<48x64xbf16>
    %cst_20 = arith.constant dense<0.000000e+00> : vector<48x16xf32>
    %36 = tpu.matmul %35, %34, %cst_20 {dimension_numbers = #tpu.dot_dimension_numbers<[1], [0], [0], [1], [0, 0, 1, 1], [], []>} : vector<48x64xbf16>, vector<64x16xbf16>, vector<48x16xf32> -> vector<48x16xf32>
    %c0_21 = arith.constant 0 : index
    %c0_22 = arith.constant 0 : index
    %37 = vector.load %arg10[%c0_21, %c0_22] : memref<48x1xf32, #tpu.memory_space<vmem>>, vector<48x1xf32>
    %38 = vector.broadcast %37 : vector<48x1xf32> to vector<48x16xf32>
    %39 = arith.addf %36, %38 : vector<48x16xf32>
    %c0_23 = arith.constant 0 : index
    %c0_24 = arith.constant 0 : index
    %c0_25 = arith.constant 0 : index
    %40 = vector.load %arg11[%c0_23, %c0_24, %c0_25] : memref<1x48x16xf32, #tpu.memory_space<vmem>>, vector<1x48x16xf32>
    %41 = vector.shape_cast %40 : vector<1x48x16xf32> to vector<48x16xf32>
    %42 = vector.shape_cast %39 : vector<48x16xf32> to vector<1x48x16xf32>
    tpu.vector_store %arg11[%c0_23, %c0_24, %c0_25], %42 {strides = array<i32>} : memref<1x48x16xf32, #tpu.memory_space<vmem>>, vector<1x48x16xf32>,
    return
  }
  func.func @transform_0(%arg0: i32, %arg1: i32) -> (i32, i32, i32) {
    %c0_i32 = arith.constant 0 : i32
    %c0_i32_0 = arith.constant 0 : i32
    return %arg0, %c0_i32, %arg1 : i32, i32, i32
  }
  func.func @transform_1(%arg0: i32, %arg1: i32) -> (i32, i32, i32) {
    %c0_i32 = arith.constant 0 : i32
    %c0_i32_0 = arith.constant 0 : i32
    %c0_i32_1 = arith.constant 0 : i32
    return %arg0, %c0_i32, %c0_i32_0 : i32, i32, i32
  }
  func.func @transform_2(%arg0: i32, %arg1: i32) -> (i32, i32, i32) {
    %c0_i32 = arith.constant 0 : i32
    %c0_i32_0 = arith.constant 0 : i32
    return %arg0, %arg1, %c0_i32 : i32, i32, i32
  }
  func.func @transform_3(%arg0: i32, %arg1: i32) -> (i32, i32) {
    %c0_i32 = arith.constant 0 : i32
    %c0_i32_0 = arith.constant 0 : i32
    %c0_i32_1 = arith.constant 0 : i32
    return %c0_i32, %c0_i32_0 : i32, i32
  }
  func.func @transform_4(%arg0: i32, %arg1: i32) -> (i32, i32) {
    %c0_i32 = arith.constant 0 : i32
    %c0_i32_0 = arith.constant 0 : i32
    %c0_i32_1 = arith.constant 0 : i32
    return %c0_i32, %c0_i32_0 : i32, i32
  }
  func.func @transform_5(%arg0: i32, %arg1: i32) -> (i32, i32) {
    %c0_i32 = arith.constant 0 : i32
    %c0_i32_0 = arith.constant 0 : i32
    %c0_i32_1 = arith.constant 0 : i32
    return %c0_i32, %c0_i32_0 : i32, i32
  }
  func.func @transform_6(%arg0: i32, %arg1: i32) -> (i32, i32) {
    %c0_i32 = arith.constant 0 : i32
    %c0_i32_0 = arith.constant 0 : i32
    %c0_i32_1 = arith.constant 0 : i32
    return %c0_i32, %c0_i32_0 : i32, i32
  }
  func.func @transform_7(%arg0: i32, %arg1: i32) -> (i32, i32) {
    %c0_i32 = arith.constant 0 : i32
    %c0_i32_0 = arith.constant 0 : i32
    %c0_i32_1 = arith.constant 0 : i32
    return %c0_i32, %c0_i32_0 : i32, i32
  }
  func.func @transform_8(%arg0: i32, %arg1: i32) -> (i32, i32) {
    %c0_i32 = arith.constant 0 : i32
    %c0_i32_0 = arith.constant 0 : i32
    %c0_i32_1 = arith.constant 0 : i32
    return %c0_i32, %c0_i32_0 : i32, i32
  }
  func.func @transform_9(%arg0: i32, %arg1: i32) -> (i32, i32, i32) {
    %c0_i32 = arith.constant 0 : i32
    %c0_i32_0 = arith.constant 0 : i32
    return %arg0, %c0_i32, %arg1 : i32, i32, i32
  }
}

</mosaic_0001>

<bundles_post_ra>
// kernel: tpu_custom_call.1
= control target key start
LH: loop header
LB: loop body
LE: loop exit
PB: predicated region body
PF: predicated region fallthrough
CT: control target
= control target key end

     0   :  { %s1729_s30 = smov 0   ;;  %s1731_s10 = smov 0   ;;  %s2002_s0 = inlined_call_operand.vmem [shape: bf16[2,64,16], index: 0, kind: input, shape index: {}]   ;;  %s2003_s1 = inlined_call_operand.vmem [shape: bf16[2,64,24], index: 1, kind: input, shape index: {}]   ;;  %s2004_s2 = inlined_call_operand.vmem [shape: f32[2,16,24], index: 2, kind: input, shape index: {}]   ;;  %s2005_s3 = inlined_call_operand.vmem [shape: bf16[64,64], index: 3, kind: input, shape index: {}]   ;;  %s2006_s4 = inlined_call_operand.vmem [shape: f32[64,1], index: 4, kind: input, shape index: {}]   ;;  %s2007_s5 = inlined_call_operand.vmem [shape: bf16[128,64], index: 5, kind: input, shape index: {}]   ;;  %s2008_s6 = inlined_call_operand.vmem [shape: f32[128,1], index: 6, kind: input, shape index: {}]   ;;  %s2009_s7 = inlined_call_operand.vmem [shape: bf16[48,64], index: 7, kind: input, shape index: {}]   ;;  %s2010_s8 = inlined_call_operand.vmem [shape: f32[48,1], index: 8, kind: input, shape index: {}]   ;;  %s2011_s9 = inlined_call_operand.vmem [shape: f32[2,48,16], index: 9, kind: output, shape index: {}]  }
   0x1   :  { %s1733_s11 = smov 0  }
   0x2 LB: > { %s31_s12 = sadd.s32 1, %s1672_s10  ;;  %p1412_p0 = scmp.ge.s32.totalorder %s1676_s11, 1  ;;  %s1676_s11 = sphi %s1733_s11, %s19_s11   ;;  %s1672_s10 = sphi %s1731_s10, %s2013_s10   ;;  %s1668_s30 = sphi %s1729_s30, %s2012_s30  }
   0x3   : > { %p33_p1 = scmp.ge.s32.totalorder %s31_s12, 2  ;;  %p333_p2 = scmp.lt.s32.totalorder %s1676_s11, 3 }
   0x5   : > { %s2015_s12 = smov (%p33_p1, %s31_s12), 0  ;;  %p334_p3 = pnand %p1412_p0, %p333_p2 }
   0x6   : > { %p389_p4 = scmp.lt.s32.totalorder (!%p334_p3), %s1668_s30, 1 }
   0x7   : > { %337 = sbr.rel (%p334_p3) target bundleno = 1164 (0x48c), region = 56 }
   0xc   : > { %v736_v0 = vld [vmem:[%s2006_s4 + $0x20] sm:$0xff]  ;;  %v1678_v1 = vmov 0   ;;  %v738_v2 = vld [vmem:[%s2006_s4 + $0x30] sm:$0xff]  ;;  %s2017_s30 = smov (!%p389_p4, %s1668_s30), 1  ;;  %v737_v5 = vld [vmem:[%s2006_s4 + $0x28] sm:$0xff]  ;;  %vm609_vm0 = vcmask 523264  }
   0xd   : > { %1631 = vset.pattern.permute.xlu0 %v1678_v1  ;;  %1632 = vset.pattern.permute.xlu1 %v1678_v1  ;;  %s1567_s17 = sshll.u32 %s2017_s30, 5  ;;  %v739_v6 = vld [vmem:[%s2006_s4 + $0x38] sm:$0xff]  ;;  %v455_v11 = vld [vmem:[%s2008_s6 + $0x30] sm:$0xff]  ;;  %v1574_v15 = vld [vmem:[%s2007_s5] sm:$0xff]  ;;  %vm691_vm1 = vcmask 191488   ;;  %vm932_vm2 = vcmask 261120  }
   0xe   : > { %762 = vperm.xlu0 %1631, %v736_v0   ;;  %772 = vperm.xlu1 %1632, %v738_v2   ;;  %s401_s20 = scalar_lea.vmem %s2003_s1, %s1567_s17  ;;  %s396_s23 = scalar_lea.vmem %s2002_s0, %s1567_s17  ;;  %v456_v12 = vld [vmem:[%s2008_s6 + $0x38] sm:$0xff]  ;;  %v1586_v16 = vld [vmem:[%s2005_s3] sm:$0xff]  ;;  %v1580_v17 = vld [vmem:[%s2007_s5 + $0x30] sm:$0xff]  ;;  %vm1007_vm3 = vcmask 195584  }
   0xf   : > { %1633 = vset.pattern.permute.xlu2 %v1678_v1  ;;  %v1573_v3 = vld [vmem:[%s401_s20 + $0x18] sm:$0xff]  ;;  %v1572_v7 = vld [vmem:[%s401_s20 + $0x10] sm:$0xff]  ;;  %v1571_v9 = vld [vmem:[%s401_s20 + $0x8] sm:$0xff]  ;;  %s1569_s27 = sshll.u32 %s2017_s30, 4  ;;  %s1605_s29 = smul.u32 48, %s2017_s30 }
  0x10   : > { %v1585_v4 = vld [vmem:[%s396_s23 + $0x18] sm:$0xff]  ;;  %638 = vmatpush.bf16.msra.mxu0 %v1573_v3  ;;  %v1584_v8 = vld [vmem:[%s396_s23 + $0x10] sm:$0xff]  ;;  %1601 = vmatpush.bf16.msra.mxu3 %v1573_v3  ;;  %v1583_v10 = vld [vmem:[%s396_s23 + $0x8] sm:$0xff]  ;;  %s410_s13 = scalar_lea.vmem %s2004_s2, %s1569_s27 }
  0x11   : > { %841 = vmatpush.bf16.msra.mxu1 %v1585_v4  ;;  %v1570_v13 = vld [vmem:[%s401_s20] sm:$0xff]  ;;  %v735_v18 = vld [vmem:[%s2006_s4 + $0x18] sm:$0xff]  ;;  %v733_v21 = vld [vmem:[%s2006_s4 + $0x8] sm:$0xff]  ;;  %s419_s15 = scalar_lea.vmem %s2011_s9, %s1605_s29 }
  0x12   : > { %v1582_v14 = vld [vmem:[%s396_s23] sm:$0xff]  ;;  %v451_v22 = vld [vmem:[%s2008_s6 + $0x10] sm:$0xff]  ;;  %v452_v23 = vld [vmem:[%s2008_s6 + $0x18] sm:$0xff] }
  0x13   : > { %v453_v19 = vld [vmem:[%s2008_s6 + $0x20] sm:$0xff]  ;;  %v1575_v24 = vld [vmem:[%s2007_s5 + $0x8] sm:$0xff]  ;;  %v734_v27 = vld [vmem:[%s2006_s4 + $0x10] sm:$0xff] }
  0x14   : > { %639 = vmatpush.bf16.msra.mxu0 %v1572_v7  ;;  %1602 = vmatpush.bf16.msra.mxu3 %v1572_v7  ;;  %v732_v20 = vld [vmem:[%s2006_s4] sm:$0xff]  ;;  %v1587_v25 = vld [vmem:[%s2005_s3 + $0x8] sm:$0xff]  ;;  %v1576_v30 = vld [vmem:[%s2007_s5 + $0x10] sm:$0xff] }
  0x15   : > { %842 = vmatpush.bf16.msra.mxu1 %v1584_v8  ;;  %742 = vperm.xlu2 %1633, %v732_v20   ;;  %v450_v26 = vld [vmem:[%s2008_s6 + $0x8] sm:$0xff]  ;;  %v461_v29 = vld [vmem:[%s2008_s6 + $0x60] sm:$0xff]  ;;  %v1588_v31 = vld [vmem:[%s2005_s3 + $0x10] sm:$0xff] }
  0x16   : > { %767 = vperm.xlu0 %1631, %v737_v5   ;;  %777 = vperm.xlu1 %1632, %v739_v6   ;;  %v454_v28 = vld [vmem:[%s2008_s6 + $0x28] sm:$0xff]  ;;  %v449_v32 = vld [vmem:[%s2008_s6] sm:$0xff]  ;;  %v1577_v33 = vld [vmem:[%s2007_s5 + $0x18] sm:$0xff] }
  0x17   : > { %v1589_v34 = vld [vmem:[%s2005_s3 + $0x18] sm:$0xff] }
  0x18   : > { %640 = vmatpush.bf16.msra.mxu0 %v1571_v9  ;;  %1603 = vmatpush.bf16.msra.mxu3 %v1571_v9 }
  0x19   : > { %843 = vmatpush.bf16.msra.mxu1 %v1583_v10 }
  0x1c   : > { %641 = vmatpush.bf16.msra.mxu0 %v1570_v13  ;;  %1604 = vmatpush.bf16.msra.mxu3 %v1570_v13 }
  0x1d   : > { %844 = vmatpush.bf16.msra.mxu1 %v1582_v14  ;;  %747 = vperm.xlu2 %1633, %v733_v21  }
  0x1e   : > { %497 = vperm.xlu0 %1631, %v455_v11   ;;  %502 = vperm.xlu1 %1632, %v456_v12  }
  0x1f   : > { %1468 = vmatmul.msk.bf16.vlgmr.msra.gmra.mxu0 %vm609_vm0, %v1574_v15  ;;  %1474 = vmatmul.msk.bf16.vlgmr.msra.gmra.mxu3 %vm609_vm0, %v1580_v17 }
  0x20   : > { %1508 = vmatmul.msk.bf16.vlgmr.msra.gmra.mxu1 %vm609_vm0, %v1586_v16 }
  0x25   : > { %752 = vperm.xlu2 %1633, %v734_v27  }
  0x26   : > { %757 = vperm.xlu0 %1631, %v735_v18   ;;  %487 = vperm.xlu1 %1632, %v453_v19  }
  0x2d   : > { %492 = vperm.xlu2 %1633, %v454_v28  }
  0x2e   : > { %477 = vperm.xlu0 %1631, %v451_v22   ;;  %482 = vperm.xlu1 %1632, %v452_v23  }
  0x2f   : > { %1469 = vmatmul.msk.bf16.gmra.mxu0 %vm609_vm0, %v1575_v24 }
  0x30   : > { %1509 = vmatmul.msk.bf16.gmra.mxu1 %vm609_vm0, %v1587_v25 }
  0x35   : > { %467 = vperm.xlu2 %1633, %v449_v32  }
  0x36   : > { %472 = vperm.xlu0 %1631, %v450_v26  }
  0x3e   : > { %527 = vperm.xlu0 %1631, %v461_v29  }
  0x3f   : > { %1470 = vmatmul.msk.bf16.gmra.mxu0 %vm609_vm0, %v1576_v30 }
  0x40   : > { %1510 = vmatmul.msk.bf16.gmra.mxu1 %vm609_vm0, %v1588_v31 }
  0x4f   : > { %1471 = vmatmul.msk.bf16.gmra.mxu0 %vm609_vm0, %v1577_v33 }
  0x50   : > { %1511 = vmatmul.msk.bf16.gmra.mxu1 %vm609_vm0, %v1589_v34 }
  0x6f   : > { %v743_v35 = vpop.permute.xlu2 %742 }
  0x77   : > { %v748_v37 = vpop.permute.xlu2 %747 }
  0x7f   : > { %v1845_v40 = vpop.permute.xlu2 %752 }
  0x80   : > { %v763_v36 = vpop.permute.xlu0 %762  ;;  %v1843_v39 = vpop.permute.xlu1 %772 }
  0x87   : > { %v493_v42 = vpop.permute.xlu2 %492 }
  0x88   : > { %v768_v38 = vpop.permute.xlu0 %767  ;;  %v1849_v43 = vpop.permute.xlu1 %777 }
  0x8f   : > { %v468_v45 = vpop.permute.xlu2 %467 }
  0x90   : > { %v1847_v41 = vpop.permute.xlu0 %497  ;;  %v1853_v50 = vpop.permute.xlu1 %502 }
  0x98   : > { %v1851_v44 = vpop.permute.xlu0 %757  ;;  %v488_v60 = vpop.permute.xlu1 %487 }
  0x9c   : > { %v643_v46 = vpop.f32.mrf.mxu0 }
  0x9d   : > { %v846_v47 = vpop.f32.mrf.mxu1  ;;  %v644_v49 = vadd.f32 %v643_v46, %v468_v45 }
  0x9e   : > { %v847_v52 = vadd.f32 %v846_v47, %v743_v35 }
  0x9f   : > { %v683_v51 = vpack.c.bf16 %v644_v49, %v644_v49 }
  0xa0   : > { %v478_v48 = vpop.permute.xlu0 %477  ;;  %v866_v55 = vpack.c.bf16 %v847_v52, %v847_v52  ;;  %v483_v9 = vpop.permute.xlu1 %482 }
  0xa1   : > { %692 = vst.msk [vmem:[#allocation2] sm:$0xf] %vm691_vm1, %v683_v51 }
  0xa2   : > { %v896_v62 = vunpack.c.l.b16 %v866_v55  ;;  %v673_v1 = vpop.f32.mrf.mxu3 }
  0xa4   : > { %v645_v53 = vpop.f32.mrf.mxu0 }
  0xa5   : > { %v848_v54 = vpop.f32.mrf.mxu1 }
  0xa6   : > { %v849_v56 = vadd.f32 %v848_v54, %v748_v37 }
  0xa8   : > { %v473_v57 = vpop.permute.xlu0 %472  ;;  %v867_v59 = vpack.c.bf16 %v849_v56, %v849_v56 }
  0xa9   : > { %v646_v58 = vadd.f32 %v645_v53, %v473_v57 }
  0xaa   : > { %v897_v63 = vunpack.c.l.b16 %v867_v59  ;;  %v675_v59 = vpop.f32.mrf.mxu3 }
  0xab   : > { %v684_v61 = vpack.c.bf16 %v646_v58, %v646_v58 }
  0xac   : > { %v900_v0 = vpack.c.b16 %v897_v63, %v896_v62  ;;  %v648_v2 = vpop.f32.mrf.mxu0  ;;  %v1578_v63 = vld [vmem:[%s2007_s5 + $0x20] sm:$0xff] }
  0xad   : > { %693 = vst.msk [vmem:[#allocation2 + $0x4] sm:$0xf] %vm691_vm1, %v684_v61  ;;  %v851_v3 = vpop.f32.mrf.mxu1  ;;  %v649_v4 = vadd.f32 %v648_v2, %v478_v48  ;;  %1472 = vmatmul.msk.bf16.gmra.mxu0 %vm609_vm0, %v1578_v63 }
  0xaf   : > { %v685_v7 = vpack.c.bf16 %v649_v4, %v649_v4  ;;  %v890_v4 = vld [vmem:[%s410_s13] sm:$0xff] }
  0xb0   : > { %v528_v5 = vpop.permute.xlu0 %527 }
  0xb1   : > { %v674_v6 = vadd.f32 %v673_v1, %v528_v5  ;;  %694 = vst.msk [vmem:[#allocation2 + $0x8] sm:$0xf] %vm691_vm1, %v685_v7 }
  0xb3   : > { %v704_v8 = vpack.c.bf16 %v674_v6, %v674_v6 }
  0xb4   : > { %v650_v10 = vpop.f32.mrf.mxu0  ;;  %v1590_v20 = vld [vmem:[#allocation2] sm:$0xff] }
  0xb5   : > { %712 = vst.msk [vmem:[#allocation3 + $0x10] sm:$0xf] %vm691_vm1, %v704_v8  ;;  %v853_v11 = vpop.f32.mrf.mxu1  ;;  %v651_v12 = vadd.f32 %v650_v10, %v483_v9 }
  0xb6   : > { %v854_v34 = vadd.f32 %v853_v11, %v1851_v44 }
  0xb7   : > { %v686_v13 = vpack.c.bf16 %v651_v12, %v651_v12 }
  0xb9   : > { %695 = vst.msk [vmem:[#allocation2 + $0xc] sm:$0xf] %vm691_vm1, %v686_v13 }
  0xbc   : > { %v653_v14 = vpop.f32.mrf.mxu0 }
  0xbd   : > { %v856_v15 = vpop.f32.mrf.mxu1  ;;  %v654_v16 = vadd.f32 %v653_v14, %v488_v60 }
  0xbe   : > { %v857_v19 = vadd.f32 %v856_v15, %v763_v36  ;;  %v852_v36 = vadd.f32 %v851_v3, %v1845_v40  ;;  %v891_v3 = vld [vmem:[%s410_s13 + $0x8] sm:$0xff] }
  0xbf   : > { %v687_v17 = vpack.c.bf16 %v654_v16, %v654_v16  ;;  %v458_v16 = vld [vmem:[%s2008_s6 + $0x48] sm:$0xff] }
  0xc0   : > { %v1591_v18 = vld [vmem:[#allocation2 + $0x8] sm:$0xff]  ;;  %v870_v23 = vpack.c.bf16 %v857_v19, %v857_v19  ;;  %v868_v46 = vpack.c.bf16 %v852_v36, %v852_v36 }
  0xc1   : > { %696 = vst.msk [vmem:[#allocation2 + $0x10] sm:$0xf] %vm691_vm1, %v687_v17  ;;  %942 = vmatpush.bf16.msra.mxu2 %v1591_v18  ;;  %v457_v17 = vld [vmem:[%s2008_s6 + $0x40] sm:$0xff]  ;;  %v1579_v18 = vld [vmem:[%s2007_s5 + $0x28] sm:$0xff] }
  0xc2   : > { %v954_v28 = vunpack.c.l.b16 %v870_v23  ;;  %v898_v44 = vunpack.c.l.b16 %v868_v46  ;;  %1473 = vmatmul.msk.bf16.gmra.mxu0 %vm609_vm0, %v1579_v18 }
  0xc4   : > { %v655_v21 = vpop.f32.mrf.mxu0 }
  0xc5   : > { %v858_v22 = vpop.f32.mrf.mxu1  ;;  %v656_v24 = vadd.f32 %v655_v21, %v493_v42  ;;  %943 = vmatpush.bf16.msra.mxu2 %v1590_v20 }
  0xc6   : > { %v859_v25 = vadd.f32 %v858_v22, %v768_v38  ;;  %v869_v38 = vpack.c.bf16 %v854_v34, %v854_v34 }
  0xc7   : > { %v688_v26 = vpack.c.bf16 %v656_v24, %v656_v24 }
  0xc8   : > { %v871_v27 = vpack.c.bf16 %v859_v25, %v859_v25 }
  0xc9   : > { %697 = vst.msk [vmem:[#allocation2 + $0x14] sm:$0xf] %vm691_vm1, %v688_v26 }
  0xca   : > { %v955_v29 = vunpack.c.l.b16 %v871_v27 }
  0xcc   : > { %v958_v30 = vpack.c.b16 %v955_v29, %v954_v28  ;;  %v658_v31 = vpop.f32.mrf.mxu0 }
  0xcd   : > { %v861_v32 = vpop.f32.mrf.mxu1  ;;  %v659_v33 = vadd.f32 %v658_v31, %v1847_v41  ;;  %v899_v41 = vunpack.c.l.b16 %v869_v38 }
  0xce   : > { %1634 = vxpose.binary.xlu1.c.b16.start [1/4] (short) (narrow) %v900_v0, %v958_v30, 16  ;;  %v862_v37 = vadd.f32 %v861_v32, %v1843_v39 }
  0xcf   : > { %v689_v35 = vpack.c.bf16 %v659_v33, %v659_v33  ;;  %v901_v54 = vpack.c.b16 %v899_v41, %v898_v44  ;;  %v464_v44 = vld [vmem:[%s2008_s6 + $0x78] sm:$0xff] }
  0xd0   : > { %v872_v47 = vpack.c.bf16 %v862_v37, %v862_v37  ;;  %v1592_v56 = vld [vmem:[#allocation2 + $0x10] sm:$0xff] }
  0xd1   : > { %698 = vst.msk [vmem:[#allocation2 + $0x18] sm:$0xf] %vm691_vm1, %v689_v35 }
  0xd2   : > { %v956_v53 = vunpack.c.l.b16 %v872_v47 }
  0xd4   : > { %v660_v42 = vpop.f32.mrf.mxu0 }
  0xd5   : > { %v863_v45 = vpop.f32.mrf.mxu1  ;;  %v661_v48 = vadd.f32 %v660_v42, %v1853_v50  ;;  %v1581_v50 = vld [vmem:[%s2007_s5 + $0x38] sm:$0xff] }
  0xd6   : > { %v864_v49 = vadd.f32 %v863_v45, %v1849_v43  ;;  %1475 = vmatmul.msk.bf16.gmra.mxu3 %vm609_vm0, %v1581_v50  ;;  %v462_v43 = vld [vmem:[%s2008_s6 + $0x68] sm:$0xff]  ;;  %v1208_v50 = vld [vmem:[%s2010_s8 + $0x20] sm:$0xff] }
  0xd7   : > { %v690_v51 = vpack.c.bf16 %v661_v48, %v661_v48 }
  0xd8   : > { %v873_v52 = vpack.c.bf16 %v864_v49, %v864_v49 }
  0xd9   : > { %699 = vst.msk [vmem:[#allocation2 + $0x1c] sm:$0xf] %vm691_vm1, %v690_v51 }
  0xda   : > { %v957_v40 = vunpack.c.l.b16 %v873_v52  ;;  %v463_v52 = vld [vmem:[%s2008_s6 + $0x70] sm:$0xff] }
  0xdc   : > { %v959_v55 = vpack.c.b16 %v957_v40, %v956_v53  ;;  %v459_v53 = vld [vmem:[%s2008_s6 + $0x50] sm:$0xff]  ;;  %v460_v40 = vld [vmem:[%s2008_s6 + $0x58] sm:$0xff] }
  0xde   : > { %1635 = vxpose.binary.xlu1.c.b16.end [2/4] (short) (narrow) %v901_v54, %v959_v55, 16  ;;  %v1204_v54 = vld [vmem:[%s2010_s8] sm:$0xff]  ;;  %v1205_v55 = vld [vmem:[%s2010_s8 + $0x8] sm:$0xff] }
  0xe0   : > { %v1593_v39 = vld [vmem:[#allocation2 + $0x18] sm:$0xff] }
  0xe1   : > { %999 = vmatpush.bf16.msrb.mxu3 %v1593_v39  ;;  %v1206_v39 = vld [vmem:[%s2010_s8 + $0x10] sm:$0xff] }
  0xe5   : > { %1000 = vmatpush.bf16.msrb.mxu3 %v1592_v56  ;;  %v1207_v56 = vld [vmem:[%s2010_s8 + $0x18] sm:$0xff] }
 0x12a   : > { %v663_v22 = vpop.f32.mrf.mxu0 }
 0x132   : > { %v665_v33 = vpop.f32.mrf.mxu0 }
 0x138   : > { %532 = vperm.xlu1 %1632, %v462_v43   ;;  %v1209_v43 = vld [vmem:[%s2010_s8 + $0x28] sm:$0xff] }
 0x159   : > { %v1881_v0 = vpop.f32.mrf.mxu3 }
 0x161   : > { %v1884_v1 = vpop.f32.mrf.mxu3 }
 0x17a   : > { %v1636_v57 = vpop.trf.xlu1 }
 0x17b   : > { %1529 = vmatmul.msk.bf16.vlgmr.msrb.gmra.mxu3 %vm932_vm2, %v1636_v57 }
 0x182   : > { %v1637_v58 = vpop.trf.xlu1 }
 0x183   : > { %1520 = vmatmul.msk.bf16.vlgmr.msra.gmra.mxu2 %vm932_vm2, %v1637_v58 }
 0x1aa   : > { %v533_v60 = vpop.permute.xlu1 %532 }
 0x1ab   : > { %v676_v61 = vadd.f32 %v675_v59, %v533_v60 }
 0x1ad   : > { %v705_v62 = vpack.c.bf16 %v676_v61, %v676_v61 }
 0x1af   : > { %713 = vst.msk [vmem:[#allocation3 + $0x14] sm:$0xf] %vm691_vm1, %v705_v62 }
 0x1fe   : > { %v1002_v2 = vpop.f32.mrf.mxu3 }
 0x1ff   : > { %v1003_v14 = vadd.f32 %v1002_v2, %v890_v4 }
 0x201   : > { %v1014_v15 = vsel %vm1007_vm3, %v1003_v14, -inf }
 0x206   : > { %v945_v5 = vpop.f32.mrf.mxu2  ;;  %v1004_v6 = vpop.f32.mrf.mxu3 }
 0x207   : > { %v946_v7 = vadd.f32 %v945_v5, %v890_v4  ;;  %v1005_v8 = vadd.f32 %v1004_v6, %v891_v3 }
 0x209   : > { %v1017_v9 = vsel %vm1007_vm3, %v1005_v8, -inf  ;;  %v1008_v10 = vsel %vm1007_vm3, %v946_v7, -inf }
 0x20a   : > { %1018 = vmax.xlane.f32.xlu0 %v1017_v9  ;;  %1009 = vmax.xlane.f32.xlu2 %v1008_v10 }
 0x20e   : > { %v947_v11 = vpop.f32.mrf.mxu2 }
 0x20f   : > { %v948_v12 = vadd.f32 %v947_v11, %v891_v3 }
 0x211   : > { %v1011_v13 = vsel %vm1007_vm3, %v948_v12, -inf }
 0x212   : > { %1012 = vmax.xlane.f32.xlu2 %v1011_v13 }
 0x21a   : > { %1015 = vmax.xlane.f32.xlu2 %v1014_v15 }
 0x21e   : > { %512 = vperm.xlu0 %1631, %v458_v16  }
 0x232   : > { %507 = vperm.xlu2 %1633, %v457_v17  }
 0x27d   : > { %v1010_v19 = vpop.xlane.xlu2 %1009  ;;  %v1019_v23 = vpop.xlane.xlu0 %1018 }
 0x27e   : > { %v1020_v20 = vsub.f32 %v946_v7, %v1010_v19  ;;  %v1023_v26 = vsub.f32 %v1005_v8, %v1019_v23 }
 0x280   : > { %v1024_v21 = vmul.f32 1.442695, %v1020_v20  ;;  %v1030_v30 = vmul.f32 1.442695, %v1023_v26 }
 0x282   : > { %1638 = vpow2.f32 %v1024_v21 }
 0x285   : > { %v1013_v24 = vpop.xlane.xlu2 %1012 }
 0x286   : > { %v1021_v25 = vsub.f32 %v948_v12, %v1013_v24 }
 0x288   : > { %v1026_v27 = vmul.f32 1.442695, %v1021_v25  ;;  %v1904_v28 = vpop.eup %1638 }
 0x289   : > { %v1032_v29 = vsel %vm1007_vm3, %v1904_v28, 0.0 }
 0x28a   : > { %1640 = vpow2.f32 %v1026_v27  ;;  %1033 = vadd.xlane.f32.xlu0 %v1032_v29 }
 0x28b   : > { %1642 = vpow2.f32 %v1030_v30 }
 0x28d   : > { %v1016_v31 = vpop.xlane.xlu2 %1015 }
 0x28e   : > { %v1022_v32 = vsub.f32 %v1003_v14, %v1016_v31  ;;  %v1952_v14 = vpop.f32.mrf.mxu0 }
 0x290   : > { %v1908_v34 = vpop.eup %1640  ;;  %v1028_v35 = vmul.f32 1.442695, %v1022_v32  ;;  %v513_v36 = vpop.permute.xlu0 %512 }
 0x291   : > { %v666_v37 = vadd.f32 %v665_v33, %v513_v36  ;;  %v1035_v38 = vsel %vm1007_vm3, %v1908_v34, 0.0  ;;  %v1913_v46 = vpop.eup %1642 }
 0x292   : > { %1644 = vpow2.f32 %v1028_v35  ;;  %1036 = vadd.xlane.f32.xlu2 %v1035_v38  ;;  %v1041_v41 = vsel %vm1007_vm3, %v1913_v46, 0.0 }
 0x293   : > { %v701_v42 = vpack.c.bf16 %v666_v37, %v666_v37 }
 0x295   : > { %709 = vst.msk [vmem:[#allocation3 + $0x4] sm:$0xf] %vm691_vm1, %v701_v42  ;;  %v508_v45 = vpop.permute.xlu2 %507 }
 0x296   : > { %v664_v47 = vadd.f32 %v663_v22, %v508_v45 }
 0x298   : > { %v1915_v48 = vpop.eup %1644  ;;  %v700_v49 = vpack.c.bf16 %v664_v47, %v664_v47 }
 0x299   : > { %v1038_v51 = vsel %vm1007_vm3, %v1915_v48, 0.0 }
 0x29a   : > { %708 = vst.msk [vmem:[#allocation3] sm:$0xf] %vm691_vm1, %v700_v49  ;;  %1042 = vadd.xlane.f32.xlu2 %v1041_v41  ;;  %1039 = vadd.xlane.f32.xlu0 %v1038_v51 }
 0x2ae   : > { %537 = vperm.xlu0 %1631, %v463_v52  }
 0x2b2   : > { %542 = vperm.xlu2 %1633, %v464_v44  }
 0x2b6   : > { %517 = vperm.xlu0 %1631, %v459_v53  }
 0x2ba   : > { %522 = vperm.xlu2 %1633, %v460_v40  }
 0x2be   : > { %1212 = vperm.xlu0 %1631, %v1204_v54  }
 0x2c2   : > { %1217 = vperm.xlu2 %1633, %v1205_v55  }
 0x2c6   : > { %1222 = vperm.xlu0 %1631, %v1206_v39  }
 0x2ca   : > { %1227 = vperm.xlu2 %1633, %v1207_v56  }
 0x2ce   : > { %1232 = vperm.xlu0 %1631, %v1208_v50  }
 0x2d2   : > { %1237 = vperm.xlu2 %1633, %v1209_v43  }
 0x2fd   : > { %v1034_v57 = vpop.xlane.xlu0 %1033 }
 0x2fe   : > { %1646 = vrcp.f32 %v1034_v57  ;;  %v1055_v63 = vand.u32 2147483648, %v1034_v57  ;;  %v1053_v4 = vand.u32 2147483647, %v1034_v57  ;;  %vm1049_vm5 = vweird.f32 %v1034_v57 }
 0x300   : > { %v1056_v8 = vor.u32 1.1754944e-38, %v1055_v63  ;;  %vm1054_vm7 = vcmp.eq.f32.partialorder %v1053_v4, 8.507059e+37 }
 0x304   : > { %v1647_v58 = vpop.eup %1646 }
 0x305   : > { %v1037_v59 = vpop.xlane.xlu2 %1036  ;;  %v1045_v60 = vmul.f32 %v1647_v58, %v1034_v57  ;;  %vm1050_vm4 = vweird.f32 %v1647_v58 }
 0x306   : > { %1648 = vrcp.f32 %v1037_v59  ;;  %vm1051_vm6 = vmor %vm1049_vm5, %vm1050_vm4  ;;  %v1070_v10 = vand.u32 2147483648, %v1037_v59  ;;  %v1068_v13 = vand.u32 2147483647, %v1037_v59  ;;  %vm1064_vm9 = vweird.f32 %v1037_v59 }
 0x307   : > { %v1046_v61 = vsub.f32 1.0, %v1045_v60 }
 0x308   : > { %v1071_v19 = vor.u32 1.1754944e-38, %v1070_v10  ;;  %vm1069_vm11 = vcmp.eq.f32.partialorder %v1068_v13, 8.507059e+37 }
 0x309   : > { %v1047_v62 = vmul.f32 %v1647_v58, %v1046_v61 }
 0x30b   : > { %v1048_v3 = vadd.f32 %v1647_v58, %v1047_v62 }
 0x30c   : > { %v1649_v2 = vpop.eup %1648 }
 0x30d   : > { %v1060_v5 = vmul.f32 %v1649_v2, %v1037_v59  ;;  %v1040_v6 = vpop.xlane.xlu0 %1039  ;;  %v1043_v7 = vpop.xlane.xlu2 %1042  ;;  %v1052_v11 = vsel %vm1051_vm6, %v1647_v58, %v1048_v3  ;;  %vm1065_vm8 = vweird.f32 %v1649_v2  ;;  %v1594_v3 = vld [vmem:[#allocation3] sm:$0xff] }
 0x30e   : > { %1650 = vrcp.f32 %v1040_v6  ;;  %v1057_v15 = vsel %vm1054_vm7, %v1056_v8, %v1052_v11  ;;  %vm1066_vm10 = vmor %vm1064_vm9, %vm1065_vm8  ;;  %v1083_v31 = vand.u32 2147483647, %v1040_v6  ;;  %v1085_v32 = vand.u32 2147483648, %v1040_v6 }
 0x30f   : > { %v1061_v9 = vsub.f32 1.0, %v1060_v5  ;;  %1652 = vrcp.f32 %v1043_v7  ;;  %v1058_v17 = vmul.f32 %v1904_v28, %v1057_v15  ;;  %v1100_v36 = vand.u32 2147483648, %v1043_v7 }
 0x310   : > { %v1098_v42 = vand.u32 2147483647, %v1043_v7  ;;  %vm1079_vm14 = vweird.f32 %v1040_v6  ;;  %vm1094_vm2 = vweird.f32 %v1043_v7  ;;  %vm1084_vm4 = vcmp.eq.f32.partialorder %v1083_v31, 8.507059e+37 }
 0x311   : > { %v1062_v12 = vmul.f32 %v1649_v2, %v1061_v9  ;;  %v1104_v30 = vpack.c.bf16 %v1058_v17, %v1058_v17  ;;  %v1101_v51 = vor.u32 1.1754944e-38, %v1100_v36 }
 0x312   : > { %vm1099_vm6 = vcmp.eq.f32.partialorder %v1098_v42, 8.507059e+37 }
 0x313   : > { %v1063_v16 = vadd.f32 %v1649_v2, %v1062_v12  ;;  %v1120_v47 = vunpack.c.l.b16 %v1104_v30 }
 0x314   : > { %v1651_v18 = vpop.eup %1650 }
 0x315   : > { %v1653_v20 = vpop.eup %1652  ;;  %v1075_v21 = vmul.f32 %v1651_v18, %v1040_v6  ;;  %v543_v22 = vpop.permute.xlu2 %542  ;;  %v1067_v23 = vsel %vm1066_vm10, %v1649_v2, %v1063_v16  ;;  %vm1080_vm12 = vweird.f32 %v1651_v18  ;;  %v1596_v6 = vld [vmem:[#allocation3 + $0x10] sm:$0xff] }
 0x316   : > { %v1090_v24 = vmul.f32 %v1653_v20, %v1043_v7  ;;  %v681_v25 = vadd.f32 %v1884_v1, %v543_v22  ;;  %v1072_v26 = vsel %vm1069_vm11, %v1071_v19, %v1067_v23  ;;  %vm1095_vm13 = vweird.f32 %v1653_v20  ;;  %v670_v1 = vpop.f32.mrf.mxu0  ;;  %vm1081_vm15 = vmor %vm1079_vm14, %vm1080_vm12  ;;  %v1599_v22 = vld [vmem:[%s2009_s7 + $0x8] sm:$0xff]  ;;  %v1600_v23 = vld [vmem:[%s2009_s7 + $0x10] sm:$0xff] }
 0x317   : > { %v1076_v27 = vsub.f32 1.0, %v1075_v21  ;;  %v1073_v29 = vmul.f32 %v1908_v34, %v1072_v26  ;;  %v1086_v34 = vor.u32 1.1754944e-38, %v1085_v32  ;;  %vm1096_vm5 = vmor %vm1094_vm2, %vm1095_vm13  ;;  %v1598_v21 = vld [vmem:[%s2009_s7] sm:$0xff] }
 0x318   : > { %v1091_v33 = vsub.f32 1.0, %v1090_v24  ;;  %v707_v28 = vpack.c.bf16 %v681_v25, %v681_v25 }
 0x319   : > { %v1077_v35 = vmul.f32 %v1651_v18, %v1076_v27  ;;  %v1105_v37 = vpack.c.bf16 %v1073_v29, %v1073_v29 }
 0x31a   : > { %v1092_v38 = vmul.f32 %v1653_v20, %v1091_v33  ;;  %715 = vst.msk [vmem:[#allocation3 + $0x1c] sm:$0xf] %vm691_vm1, %v707_v28 }
 0x31b   : > { %v1078_v45 = vadd.f32 %v1651_v18, %v1077_v35  ;;  %v1121_v49 = vunpack.c.l.b16 %v1105_v37 }
 0x31c   : > { %v1093_v41 = vadd.f32 %v1653_v20, %v1092_v38 }
 0x31d   : > { %v523_v52 = vpop.permute.xlu2 %522  ;;  %v1122_v44 = vpack.c.b16 %v1121_v49, %v1120_v47  ;;  %v1082_v53 = vsel %vm1081_vm15, %v1651_v18, %v1078_v45 }
 0x31e   : > { %v671_v40 = vadd.f32 %v670_v1, %v523_v52  ;;  %v1087_v54 = vsel %vm1084_vm4, %v1086_v34, %v1082_v53  ;;  %v1097_v55 = vsel %vm1096_vm5, %v1653_v20, %v1093_v41 }
 0x31f   : > { %v1130_v39 = vsel %vm1007_vm3, %v1122_v44, 0  ;;  %v1088_v56 = vmul.f32 %v1915_v48, %v1087_v54  ;;  %v1102_v50 = vsel %vm1099_vm6, %v1101_v51, %v1097_v55 }
 0x320   : > { %v703_v43 = vpack.c.bf16 %v671_v40, %v671_v40  ;;  %v538_v57 = vpop.permute.xlu0 %537  ;;  %1139 = vmatpush.bf16.xpose.msrb.mxu2 %v1130_v39  ;;  %v1103_v58 = vmul.f32 %v1913_v46, %v1102_v50 }
 0x321   : > { %v679_v59 = vadd.f32 %v1881_v0, %v538_v57  ;;  %v1106_v60 = vpack.c.bf16 %v1088_v56, %v1088_v56 }
 0x322   : > { %711 = vst.msk [vmem:[#allocation3 + $0xc] sm:$0xf] %vm691_vm1, %v703_v43  ;;  %v1107_v61 = vpack.c.bf16 %v1103_v58, %v1103_v58 }
 0x323   : > { %v706_v62 = vpack.c.bf16 %v679_v59, %v679_v59  ;;  %v1163_v63 = vunpack.c.l.b16 %v1106_v60 }
 0x324   : > { %v1164_v2 = vunpack.c.l.b16 %v1107_v61 }
 0x325   : > { %714 = vst.msk [vmem:[#allocation3 + $0x18] sm:$0xf] %vm691_vm1, %v706_v62  ;;  %v1218_v27 = vpop.permute.xlu2 %1217 }
 0x326   : > { %v1165_v4 = vpack.c.b16 %v1164_v2, %v1163_v63 }
 0x327   : > { %1538 = vmatmul.msk.bf16.vlgmr.msrb.gmra.mxu2 %vm1007_vm3, %v1594_v3 }
 0x328   : > { %v518_v48 = vpop.permute.xlu0 %517  ;;  %v1173_v5 = vsel %vm1007_vm3, %v1165_v4, 0 }
 0x329   : > { %v669_v46 = vadd.f32 %v1952_v14, %v518_v48  ;;  %1182 = vmatpush.bf16.xpose.msra.mxu3 %v1173_v5 }
 0x32b   : > { %v702_v0 = vpack.c.bf16 %v669_v46, %v669_v46 }
 0x32c   : > { %v1597_v8 = vld [vmem:[#allocation3 + $0x18] sm:$0xff] }
 0x32d   : > { %710 = vst.msk [vmem:[#allocation3 + $0x8] sm:$0xf] %vm691_vm1, %v702_v0  ;;  %vm1288_vm1 = vcmask 130048   ;;  %v1228_v28 = vpop.permute.xlu2 %1227 }
 0x330   : > { %1548 = vmatmul.msk.bf16.vlgmr.msra.gmra.mxu3 %vm1007_vm3, %v1596_v6  ;;  %v1213_v24 = vpop.permute.xlu0 %1212 }
 0x334   : > { %v1595_v7 = vld [vmem:[#allocation3 + $0x8] sm:$0xff] }
 0x335   : > { %v1238_v45 = vpop.permute.xlu2 %1237 }
 0x337   : > { %1539 = vmatmul.msk.bf16.gmra.mxu2 %vm1007_vm3, %v1595_v7 }
 0x338   : > { %v1223_v31 = vpop.permute.xlu0 %1222 }
 0x340   : > { %1549 = vmatmul.msk.bf16.gmra.mxu3 %vm1007_vm3, %v1597_v8  ;;  %v1233_v37 = vpop.permute.xlu0 %1232 }
 0x3aa   : > { %v1141_v9 = vpop.f32.mrf.mxu2 }
 0x3b2   : > { %v1143_v12 = vpop.f32.mrf.mxu2 }
 0x3b3   : > { %v1184_v10 = vpop.f32.mrf.mxu3  ;;  %v1194_v20 = vpack.c.bf16 %v1143_v12, %v1141_v9 }
 0x3ba   : > { %v1146_v15 = vpop.f32.mrf.mxu2 }
 0x3bb   : > { %v1186_v11 = vpop.f32.mrf.mxu3 }
 0x3bc   : > { %v1196_v17 = vpack.c.bf16 %v1186_v11, %v1184_v10 }
 0x3c2   : > { %v1148_v18 = vpop.f32.mrf.mxu2 }
 0x3c3   : > { %v1189_v13 = vpop.f32.mrf.mxu3  ;;  %v1195_v19 = vpack.c.bf16 %v1148_v18, %v1146_v15 }
 0x3cb   : > { %v1191_v14 = vpop.f32.mrf.mxu3 }
 0x3cc   : > { %v1197_v16 = vpack.c.bf16 %v1191_v14, %v1189_v13 }
 0x3ce   : > { %1268 = vmatpush.bf16.msra.mxu2 %v1197_v16 }
 0x3d2   : > { %1269 = vmatpush.bf16.msra.mxu2 %v1196_v17 }
 0x3d6   : > { %1270 = vmatpush.bf16.msra.mxu2 %v1195_v19 }
 0x3da   : > { %1271 = vmatpush.bf16.msra.mxu2 %v1194_v20 }
 0x3dd   : > { %1562 = vmatmul.msk.bf16.vlgmr.msra.gmra.mxu2 %vm609_vm0, %v1598_v21 }
 0x3ed   : > { %1563 = vmatmul.msk.bf16.gmra.mxu2 %vm609_vm0, %v1599_v22 }
 0x3fd   : > { %1564 = vmatmul.msk.bf16.gmra.mxu2 %vm609_vm0, %v1600_v23 }
 0x460   : > { %v1273_v25 = vpop.f32.mrf.mxu2 }
 0x461   : > { %v1274_v26 = vadd.f32 %v1273_v25, %v1213_v24 }
 0x463   : > { %1289 = vst.msk [vmem:[%s419_s15] sm:$0xff] %vm1288_vm1, %v1274_v26 }
 0x468   : > { %v1275_v29 = vpop.f32.mrf.mxu2 }
 0x469   : > { %v1276_v30 = vadd.f32 %v1275_v29, %v1218_v27 }
 0x46b   : > { %1290 = vst.msk [vmem:[%s419_s15 + $0x8] sm:$0xff] %vm1288_vm1, %v1276_v30 }
 0x470   : > { %v1278_v32 = vpop.f32.mrf.mxu2 }
 0x471   : > { %v1279_v33 = vadd.f32 %v1278_v32, %v1223_v31 }
 0x473   : > { %1291 = vst.msk [vmem:[%s419_s15 + $0x10] sm:$0xff] %vm1288_vm1, %v1279_v33 }
 0x478   : > { %v1280_v35 = vpop.f32.mrf.mxu2 }
 0x479   : > { %v1281_v36 = vadd.f32 %v1280_v35, %v1228_v28 }
 0x47b   : > { %1292 = vst.msk [vmem:[%s419_s15 + $0x18] sm:$0xff] %vm1288_vm1, %v1281_v36 }
 0x480   : > { %v1283_v38 = vpop.f32.mrf.mxu2 }
 0x481   : > { %v1284_v42 = vadd.f32 %v1283_v38, %v1233_v37 }
 0x483   : > { %1293 = vst.msk [vmem:[%s419_s15 + $0x20] sm:$0xff] %vm1288_vm1, %v1284_v42 }
 0x488   : > { %v1285_v1 = vpop.f32.mrf.mxu2 }
 0x489   : > { %v1286_v47 = vadd.f32 %v1285_v1, %v1238_v45 }
 0x48b   : > { %1294 = vst.msk [vmem:[%s419_s15 + $0x28] sm:$0xff] %vm1288_vm1, %v1286_v47 }
 0x48c PF: > { %s19_s11 = sadd.s32 1, %s1676_s11   ;;  %s2012_s30 = smov %s1672_s10 }
 0x48d   : > { %p16_p5 = scmp.ge.s32.totalorder %s19_s11, 4   ;;  %s2013_s10 = smov %s2015_s12 }
 0x48f   :  { %18 = sbr.rel (!%p16_p5) target bundleno = 2 (0x2), region = 96 }

</bundles_post_ra>
